<compile_context>
chip_gen: v7x
topology: tpu7x:2x2x1
jax: 0.10.0
libtpu: 0.0.40
codegen_flags: <defaults>
</compile_context>

<pallas_src>
import jax
import jax.numpy as jnp
from jax import lax
from jax.experimental import pallas as pl
from jax.experimental.pallas import tpu as pltpu


def _round_up(x, m):
    return (x + m - 1) // m * m


def _vmem_capacity_bytes():
    """Physical VMEM per TensorCore; conservative (v7x) fallback if the query fails."""
    try:
        info = pltpu.get_tpu_info()
        for attr in ("vmem_capacity_bytes", "vmem_bytes", "vmem_capacity"):
            v = getattr(info, attr, None)
            if v:
                return int(v)
    except Exception:
        pass
    return 64 << 20  # v7x per-TensorCore VMEM — the smallest across v5e/v6e/v7x


def _footprint_bytes(tm, tn, tk, in_item, out_item):
    # Double-buffered x / weight / bias input tiles + double-buffered output tile
    # + f32 accumulator scratch (conservative: also charged in the K-unblocked case).
    return (2 * (tm + tn) * tk * in_item
            + 2 * tn * 4
            + 2 * tm * tn * out_item
            + tm * tn * 4)


def _choose_tiles(B, L_pad, D, in_item, out_item, budget):
    """Pick (tm, tn, tk, D_pad): maximize tm (weight re-streaming), then tn, then tk,
    under the per-generation VMEM budget.  tn/tk only take values that divide the
    (lightly) padded dims so the weight is not padded when L and D are 128-aligned."""
    sub = 16 if in_item < 4 else 8          # sublane packing multiple (bf16 packs 2/row)
    b_ceil = _round_up(B, sub)

    tm_opts = []
    if b_ceil <= 2048:                      # single-batch-tile option (weight streamed once)
        tm_opts.append(b_ceil)
    for t in (1024, 512, 256, 128, 64, 32, 16):
        t = min(t, b_ceil)
        if t % sub == 0 and t not in tm_opts:
            tm_opts.append(t)
    tm_opts.sort(reverse=True)

    # Lane-dense output tiles (multiples of 128) that divide L_pad exactly.
    tn_opts = [t for t in range(min(L_pad, 1024), 0, -128) if L_pad % t == 0]

    # K tiles: prefer the full (unpadded) D; otherwise 128-multiples dividing D_pad.
    if D % 128 == 0:
        tk_opts = [(t, D) for t in range(D, 0, -128) if D % t == 0]
    else:
        d_pad = _round_up(D, 128)
        tk_opts = [(D, D)] + [(t, d_pad) for t in range(d_pad, 0, -128) if d_pad % t == 0]

    for tm in tm_opts:
        for tn in tn_opts:
            for tk, d_pad in tk_opts:
                if _footprint_bytes(tm, tn, tk, in_item, out_item) <= budget:
                    return tm, tn, tk, d_pad
    tk, d_pad = tk_opts[-1]                 # defensive: smallest legal configuration
    return tm_opts[-1], tn_opts[-1], tk, d_pad


def _linear_head_kernel_kblocked(x_ref, w_ref, b_ref, o_ref, acc_ref):
    # Grid = (parallel, parallel, k); the reduction axis k is always last ("arbitrary").
    k = pl.program_id(2)

    @pl.when(k == 0)
    def _init():
        acc_ref[...] = jnp.zeros_like(acc_ref)

    # Contract over D directly (contracting dims (1,1)) — no `.T`; lowers to the MXU's
    # transposed-RHS form with an f32 accumulator.
    # TODO(synk): confirm via pl.lower_as_mlir that no per-step XLU transpose is emitted;
    # if it is, accept a pre-transposed (D, L) weight at parameter-load time instead.
    acc_ref[...] += lax.dot_general(
        x_ref[...], w_ref[...],
        dimension_numbers=(((1,), (1,)), ((), ())),
        preferred_element_type=jnp.float32,
    )

    @pl.when(k == pl.num_programs(2) - 1)
    def _finalize():
        o_ref[...] = (acc_ref[...] + b_ref[...].astype(jnp.float32)).astype(o_ref.dtype)


def _linear_head_kernel_fullk(x_ref, w_ref, b_ref, o_ref):
    # K unblocked: single contraction, no accumulator round-trips, no reduction grid axis.
    acc = lax.dot_general(
        x_ref[...], w_ref[...],
        dimension_numbers=(((1,), (1,)), ((), ())),
        preferred_element_type=jnp.float32,
    )
    o_ref[...] = (acc + b_ref[...].astype(jnp.float32)).astype(o_ref.dtype)


def linear_head(x, weight, bias, *, compute_dtype=jnp.bfloat16, allow_jax_fallback=True):
    """y = x @ weight.T + bias (nn.Linear semantics) as a tiled, pipelined Pallas TPU kernel.

    compute_dtype: streaming dtype for x / weight.  Default bf16 — a classifier head is
    HBM-bandwidth-bound, bf16 halves the streamed bytes on v5e/v6e/v7x while accumulation
    stays in f32.  Pass None (or jnp.float32) for full-precision operand streaming.
    """
    B, D = x.shape
    L, D2 = weight.shape
    assert D == D2, "input_dimensions mismatch"
    assert bias.shape == (L,)
    out_dtype = x.dtype

    if compute_dtype is not None:
        x = x.astype(compute_dtype)
        weight = weight.astype(compute_dtype)
    in_item = jnp.dtype(x.dtype).itemsize
    out_item = jnp.dtype(out_dtype).itemsize

    # Tiny-shape fallback: pallas_call launch + pad/slice overhead dwarfs the work; let
    # XLA's fused matmul handle it (same math: f32 accumulation, f32 bias add).
    if allow_jax_fallback and (L * D * in_item) < (4 << 20):
        acc = lax.dot_general(x, weight, dimension_numbers=(((1,), (1,)), ((), ())),
                              preferred_element_type=jnp.float32)
        return (acc + bias.astype(jnp.float32)).astype(out_dtype)

    # Per-generation VMEM budgeting: 128 MiB physical on v5e/v6e, 64 MiB per TC on v7x.
    capacity = _vmem_capacity_bytes()
    vmem_limit = int(min(max(capacity * 3 // 4, 32 << 20), 100 << 20))  # ~48 MiB v7x, ~96-100 MiB v5e/v6e
    budget = max(vmem_limit - (6 << 20), 2 << 20)                       # headroom for compiler scratch

    L_pad = _round_up(L, 128)
    tm, tn, tk, D_pad = _choose_tiles(B, L_pad, D, in_item, out_item, budget)
    B_pad = _round_up(B, tm)

    # Pad only when required.  Padding the weight costs a full extra HBM pass, so the tile
    # choices above avoid it entirely whenever L and D are already 128-aligned.
    if (B_pad, D_pad) != (B, D):
        x = jnp.pad(x, ((0, B_pad - B), (0, D_pad - D)))
    if (L_pad, D_pad) != (L, D):
        weight = jnp.pad(weight, ((0, L_pad - L), (0, D_pad - D)))
    bias2d = (jnp.pad(bias, (0, L_pad - L)) if L_pad != L else bias).reshape(1, L_pad)

    n_i = B_pad // tm       # batch tiles
    n_j = L_pad // tn       # label tiles
    n_k = D_pad // tk       # reduction tiles
    # Megacore (v7x): put the parallel axis most likely to have >=2 tiles first.
    label_major = n_j >= n_i

    cost = pl.CostEstimate(
        flops=2 * B * L * D,
        transcendentals=0,
        bytes_accessed=(B_pad * D_pad + L_pad * D_pad) * in_item
                       + B_pad * L_pad * out_item + L_pad * 4,
    )

    if n_k == 1:
        if label_major:
            grid = (n_j, n_i)
            x_map = lambda j, i: (i, 0)
            w_map = lambda j, i: (j, 0)
            b_map = lambda j, i: (0, j)
            o_map = lambda j, i: (i, j)
        else:
            grid = (n_i, n_j)
            x_map = lambda i, j: (i, 0)
            w_map = lambda i, j: (j, 0)
            b_map = lambda i, j: (0, j)
            o_map = lambda i, j: (i, j)
        kernel = _linear_head_kernel_fullk
        scratch = []
        semantics = ("parallel", "parallel")
    else:
        if label_major:
            grid = (n_j, n_i, n_k)
            x_map = lambda j, i, k: (i, k)
            w_map = lambda j, i, k: (j, k)
            b_map = lambda j, i, k: (0, j)
            o_map = lambda j, i, k: (i, j)
        else:
            grid = (n_i, n_j, n_k)
            x_map = lambda i, j, k: (i, k)
            w_map = lambda i, j, k: (j, k)
            b_map = lambda i, j, k: (0, j)
            o_map = lambda i, j, k: (i, j)
        kernel = _linear_head_kernel_kblocked
        scratch = [pltpu.VMEM((tm, tn), jnp.float32)]
        semantics = ("parallel", "parallel", "arbitrary")

    out_padded = pl.pallas_call(
        kernel,
        out_shape=jax.ShapeDtypeStruct((B_pad, L_pad), out_dtype),
        grid_spec=pltpu.PrefetchScalarGridSpec(
            num_scalar_prefetch=0,
            grid=grid,
            in_specs=[
                pl.BlockSpec((tm, tk), x_map),   # x tile
                pl.BlockSpec((tn, tk), w_map),   # weight tile
                pl.BlockSpec((1, tn), b_map),    # bias tile
            ],
            out_specs=pl.BlockSpec((tm, tn), o_map),
            scratch_shapes=scratch,
        ),
        compiler_params=pltpu.CompilerParams(
            dimension_semantics=semantics,
            vmem_limit_bytes=vmem_limit,
        ),
        cost_estimate=cost,
    )(x, weight, bias2d)

    if (B_pad, L_pad) != (B, L):
        out_padded = out_padded[:B, :L]
    return out_padded


if __name__ == "__main__":
    key = jax.random.PRNGKey(0)
    kx, kw, kb, kx2, kw2, kb2 = jax.random.split(key, 6)

    # --- Small shapes consistent with the module; f32 streaming, Pallas path forced. ---
    batch, input_dimensions, labels = 8, 32, 8
    bound = 1.0 / jnp.sqrt(jnp.float32(input_dimensions))
    x = jax.random.normal(kx, (batch, input_dimensions), dtype=jnp.float32)
    weight = jax.random.uniform(kw, (labels, input_dimensions), dtype=jnp.float32,
                                minval=-bound, maxval=bound)
    bias = jax.random.uniform(kb, (labels,), dtype=jnp.float32, minval=-bound, maxval=bound)

    out = jax.block_until_ready(
        linear_head(x, weight, bias, compute_dtype=None, allow_jax_fallback=False))
    ref = x @ weight.T + bias
    assert out.shape == (batch, labels)
    assert jnp.allclose(out, ref, atol=1e-5, rtol=1e-5)

    # --- Same small shapes through the tiny-shape JAX fallback (default bf16 streaming). ---
    out_fb = jax.block_until_ready(linear_head(x, weight, bias))
    ref_bf = (x.astype(jnp.bfloat16).astype(jnp.float32)
              @ weight.astype(jnp.bfloat16).astype(jnp.float32).T + bias)
    assert jnp.allclose(out_fb, ref_bf, atol=1e-3, rtol=1e-3)

    # --- Modest shapes exercising the tiled Pallas path with default bf16 streaming. ---
    B2, D2, L2 = 256, 384, 640
    bound2 = 1.0 / jnp.sqrt(jnp.float32(D2))
    x2 = jax.random.normal(kx2, (B2, D2), dtype=jnp.float32)
    w2 = jax.random.uniform(kw2, (L2, D2), dtype=jnp.float32, minval=-bound2, maxval=bound2)
    b2 = jax.random.uniform(kb2, (L2,), dtype=jnp.float32, minval=-bound2, maxval=bound2)

    out2 = jax.block_until_ready(linear_head(x2, w2, b2, allow_jax_fallback=False))
    ref2 = (x2.astype(jnp.bfloat16).astype(jnp.float32)
            @ w2.astype(jnp.bfloat16).astype(jnp.float32).T + b2)
    assert out2.shape == (B2, L2)
    assert jnp.allclose(out2, ref2, atol=2e-2, rtol=2e-2)

    print("KERNEL_OK")
</pallas_src>

<mosaic_0001>
module attributes {stable_mosaic.version = 11 : i64} {
  func.func @_linear_head_kernel_fullk(%arg0: i32, %arg1: i32, %arg2: memref<8x32xf32, #tpu.memory_space<vmem>>, %arg3: memref<128x32xf32, #tpu.memory_space<vmem>>, %arg4: memref<1x128xf32, #tpu.memory_space<vmem>>, %arg5: memref<8x128xf32, #tpu.memory_space<vmem>>) attributes {dimension_semantics = [#tpu.dimension_semantics<parallel>, #tpu.dimension_semantics<parallel>], iteration_bounds = array<i64: 1, 1>, scalar_prefetch = 0 : i64, scratch_operands = 0 : i64, tpu.core_type = #tpu.core_type<tc>, window_params = [{transform_indices = @transform_0, window_bounds = array<i64: 8, 32>}, {transform_indices = @transform_1, window_bounds = array<i64: 128, 32>}, {transform_indices = @transform_2, window_bounds = array<i64: 1, 128>}, {transform_indices = @transform_3, window_bounds = array<i64: 8, 128>}]} {
    %c0 = arith.constant 0 : index
    %c0_0 = arith.constant 0 : index
    %0 = vector.load %arg2[%c0, %c0_0] : memref<8x32xf32, #tpu.memory_space<vmem>>, vector<8x32xf32>
    %c0_1 = arith.constant 0 : index
    %c0_2 = arith.constant 0 : index
    %1 = vector.load %arg3[%c0_1, %c0_2] : memref<128x32xf32, #tpu.memory_space<vmem>>, vector<128x32xf32>
    %cst = arith.constant dense<0.000000e+00> : vector<8x128xf32>
    %2 = tpu.matmul %0, %1, %cst {dimension_numbers = #tpu.dot_dimension_numbers<[1], [1], [0], [0], [0, 0, 1, 0], [], []>} : vector<8x32xf32>, vector<128x32xf32>, vector<8x128xf32> -> vector<8x128xf32>
    %c0_3 = arith.constant 0 : index
    %c0_4 = arith.constant 0 : index
    %3 = vector.load %arg4[%c0_3, %c0_4] : memref<1x128xf32, #tpu.memory_space<vmem>>, vector<1x128xf32>
    %4 = vector.broadcast %3 : vector<1x128xf32> to vector<8x128xf32>
    %5 = arith.addf %2, %4 : vector<8x128xf32>
    %c0_5 = arith.constant 0 : index
    %c0_6 = arith.constant 0 : index
    %6 = vector.load %arg5[%c0_5, %c0_6] : memref<8x128xf32, #tpu.memory_space<vmem>>, vector<8x128xf32>
    tpu.vector_store %arg5[%c0_5, %c0_6], %5 {strides = array<i32>} : memref<8x128xf32, #tpu.memory_space<vmem>>, vector<8x128xf32>,
    return
  }
  func.func @transform_0(%arg0: i32, %arg1: i32) -> (i32, i32) {
    %c0_i32 = arith.constant 0 : i32
    %c0_i32_0 = arith.constant 0 : i32
    return %arg1, %c0_i32 : i32, i32
  }
  func.func @transform_1(%arg0: i32, %arg1: i32) -> (i32, i32) {
    %c0_i32 = arith.constant 0 : i32
    %c0_i32_0 = arith.constant 0 : i32
    return %arg0, %c0_i32 : i32, i32
  }
  func.func @transform_2(%arg0: i32, %arg1: i32) -> (i32, i32) {
    %c0_i32 = arith.constant 0 : i32
    %c0_i32_0 = arith.constant 0 : i32
    return %c0_i32, %arg0 : i32, i32
  }
  func.func @transform_3(%arg0: i32, %arg1: i32) -> (i32, i32) {
    %c0_i32 = arith.constant 0 : i32
    return %arg1, %arg0 : i32, i32
  }
}

</mosaic_0001>

<bundles_post_ra>
// kernel: tpu_custom_call.1
= control target key start
LH: loop header
LB: loop body
LE: loop exit
PB: predicated region body
PF: predicated region fallthrough
CT: control target
= control target key end

     0   :  { %vm39_vm0 = vcmask 261120   ;;  %v306_v2 = vmov 0.0|0.0   ;;  %vm307_vm2 = vmmov 0   ;;  %v308_v5 = vmov 0.0   ;;  %s419_s0 = inlined_call_operand.vmem [shape: f32[8,32], index: 0, kind: input, shape index: {}]   ;;  %s420_s1 = inlined_call_operand.vmem [shape: f32[128,32], index: 1, kind: input, shape index: {}]   ;;  %s421_s2 = inlined_call_operand.vmem [shape: f32[1,128], index: 2, kind: input, shape index: {}]   ;;  %s422_s3 = inlined_call_operand.hbm [shape: f32[8,128], index: 3, kind: output, shape index: {}]  }
   0x1   :  { %v16_v0 = vld [vmem:[%s420_s1] sm:$0xff]  ;;  %v17_v1 = vld [vmem:[%s420_s1 + $0x8] sm:$0xff]  ;;  %246 = vmatprep.subr.bf16.mxu0 %v306_v2  ;;  %vm338_vm1 = vmpackc.low %vm39_vm0, %vm39_vm0  ;;  %243 = vmatprep.mubr.msk.f32.mxu0 %vm307_vm2, %v308_v5 }
   0x2   :  { %v247_v3 = vpack.c.bf16 %v17_v1, %v16_v0  ;;  %v18_v6 = vld [vmem:[%s420_s1 + $0x10] sm:$0xff]  ;;  %v19_v7 = vld [vmem:[%s420_s1 + $0x18] sm:$0xff] }
   0x4   :  { %249 = vmatpush3.bf16.xpose.msk.msra.mxu0 %vm338_vm1, %v247_v3 }
   0x5   :  { %250 = vmatprep.subr.bf16.mxu0 %v306_v2 }
   0x6   :  { %8 = vsyncpa [#allocation3], 0  ;;  %v251_v8 = vpack.c.bf16 %v19_v7, %v18_v6  ;;  %v20_v9 = vld [vmem:[%s420_s1 + $0x20] sm:$0xff]  ;;  %v21_v10 = vld [vmem:[%s420_s1 + $0x28] sm:$0xff]  ;;  %s309_s21 = smov [#allocation2]  }
   0x7   :  { %v255_v11 = vpack.c.bf16 %v21_v10, %v20_v9  ;;  %v22_v12 = vld [vmem:[%s420_s1 + $0x30] sm:$0xff]  ;;  %v23_v13 = vld [vmem:[%s420_s1 + $0x38] sm:$0xff]  ;;  %v24_v15 = vld [vmem:[%s420_s1 + $0x40] sm:$0xff]  ;;  %s168_s22 = sshll.u32 %s309_s21, 4  ;;  %s169_s22 = int_to_ptr.vmem [resolvable:$true] %s168_s22 }
   0x8   :  { %v259_v14 = vpack.c.bf16 %v23_v13, %v22_v12  ;;  %v25_v16 = vld [vmem:[%s420_s1 + $0x48] sm:$0xff]  ;;  %v26_v18 = vld [vmem:[%s420_s1 + $0x50] sm:$0xff]  ;;  %v27_v19 = vld [vmem:[%s420_s1 + $0x58] sm:$0xff]  ;;  %p287_p1 = scmp.lt.s32.totalorder %s169_s22, %s169_s22 }
   0x9   :  { %v263_v17 = vpack.c.bf16 %v25_v16, %v24_v15  ;;  %v267_v20 = vpack.c.bf16 %v27_v19, %v26_v18  ;;  %v28_v21 = vld [vmem:[%s420_s1 + $0x60] sm:$0xff]  ;;  %v29_v22 = vld [vmem:[%s420_s1 + $0x68] sm:$0xff]  ;;  %v30_v24 = vld [vmem:[%s420_s1 + $0x70] sm:$0xff] }
   0xa   :  { %v271_v23 = vpack.c.bf16 %v29_v22, %v28_v21  ;;  %v31_v25 = vld [vmem:[%s420_s1 + $0x78] sm:$0xff]  ;;  %v15_v27 = vld [vmem:[%s419_s0] sm:$0xff]  ;;  %s282_s1 = scalar_lea.vmem %s169_s22, 128 }
   0xb   :  { %v275_v26 = vpack.c.bf16 %v31_v25, %v30_v24  ;;  %v176_v28 = vld [vmem:[%s421_s2] ss:$0 sm:$0xff]  ;;  %p283_p0 = scmp.ne.s32.totalorder %s169_s22, %s282_s1  ;;  %p288_p2 = scmp.lt.s32.totalorder %s282_s1, %s282_s1 }
   0xc   :  { %253 = vmatpush3.bf16.xpose.msk.msra.mxu0 %vm338_vm1, %v251_v8 }
   0xd   :  { %254 = vmatprep.subr.bf16.mxu0 %v306_v2  ;;  %p289_p3 = por %p288_p2, %p287_p1 }
   0xf   :  { %p290_p4 = pnand %p289_p3, %p283_p0 }
  0x14   :  { %257 = vmatpush3.bf16.xpose.msk.msra.mxu0 %vm338_vm1, %v255_v11 }
  0x15   :  { %258 = vmatprep.subr.bf16.mxu0 %v306_v2 }
  0x1c   :  { %261 = vmatpush3.bf16.xpose.msk.msra.mxu0 %vm338_vm1, %v259_v14 }
  0x1d   :  { %262 = vmatprep.subr.bf16.mxu0 %v306_v2 }
  0x24   :  { %265 = vmatpush3.bf16.xpose.msk.msra.mxu0 %vm338_vm1, %v263_v17 }
  0x25   :  { %266 = vmatprep.subr.bf16.mxu0 %v306_v2 }
  0x2c   :  { %269 = vmatpush3.bf16.xpose.msk.msra.mxu0 %vm338_vm1, %v267_v20 }
  0x2d   :  { %270 = vmatprep.subr.bf16.mxu0 %v306_v2 }
  0x34   :  { %273 = vmatpush3.bf16.xpose.msk.msra.mxu0 %vm338_vm1, %v271_v23 }
  0x35   :  { %274 = vmatprep.subr.bf16.mxu0 %v306_v2 }
  0x3c   :  { %277 = vmatpush3.bf16.xpose.msk.msra.mxu0 %vm338_vm1, %v275_v26 }
  0x43   :  { %244 = vmatmul.mubr.msk.f32.vlgmr.msra.gmra.mrb[0].mxu0 %vm39_vm0, %v15_v27 }
 0x116   :  { %v157_v29 = vpop.f32.mrb[0].mxu0 }
 0x117   :  { %v158_v30 = vadd.f32 %v176_v28, %v157_v29  ;;  %v245_v31 = vpop.f32.mrb[1].mxu0 }
 0x119   :  { %161 = vst [vmem:[#allocation2] sm:$0xff] %v158_v30 }
 0x11a   :  { %293 = shalt.err (!%p290_p4)
}
 0x11b   :  { %s294_s24 = scalar_lea.hbm %s422_s3, 128 }
 0x11c   :  { %p295_p5 = scmp.ne.s32.totalorder %s422_s3, %s294_s24  ;;  %p298_p6 = scmp.lt.u32.totalorder %s294_s24, %s422_s3 }
 0x11e   :  { %p300_p7 = pnand %p298_p6, %p295_p5 }
 0x120   :  { %303 = shalt.err (!%p300_p7)
}
 0x121   :  { %171 = dma.vmem_to_hbm [thread:$0]  %s169_s22, 128, %s422_s3, [#allocation3]  }
 0x122   :  { %304 = dma.done.wait [#allocation3], 128  }
 0x123   :  { %305 = vsyncadd [#allocation3], 4294967168 }
 0x124   :  { %175 = vsyncpa [#allocation3], 1 }

</bundles_post_ra>
